<compile_context>
chip_gen: v7x
topology: tpu7x:2x2x1
jax: 0.10.0
libtpu: 0.0.40
codegen_flags: <defaults>
</compile_context>

<pallas_src>
import functools
from collections import defaultdict

import jax
import jax.numpy as jnp
from jax.scipy.linalg import block_diag
from jax.experimental import pallas as pl
from jax.experimental.pallas import tpu as pltpu

_TM_MAX = 4096                  # lane-tile ceiling for the matmul kernels


def _ceil_to(x, m):
    return ((x + m - 1) // m) * m


def _default_vmem_limit():
    """Scoped-VMEM budget derived per generation (half of physical VMEM)."""
    try:
        info = pltpu.get_tpu_info()
        cap = getattr(info, "vmem_capacity_bytes", None)
        if cap:
            return int(min(cap // 2, 128 * 1024 * 1024))
    except Exception:
        pass
    return 32 * 1024 * 1024


_VMEM_LIMIT = _default_vmem_limit()


def _pick_tile(m, tmax=_TM_MAX):
    """128-aligned lane tile <= tmax, preferring >=2 grid steps (v7x megacore)."""
    m128 = _ceil_to(max(m, 1), 128)
    if m128 <= 128:
        tm = 128
    elif m128 <= 2 * tmax:
        tm = min(_ceil_to(m128 // 2, 128), tmax)
    else:
        tm = tmax
    return tm, _ceil_to(m, tm)


# --------------------------------------------------------------------------
# Kernel 1: fused nn.Embedding + VoxelEncoder (strided Conv3d, kernel==stride)
# --------------------------------------------------------------------------

def _embed_conv_kernel(idx_ref, w_ref, b_ref, o_ref, *, num_classes):
    """out (Cout, TM) = W_eff (Cout, K*P) @ onehot (K*P, TM) + bias.

    idx_ref : (P, TM)       int32  patch of class indices (P = dx*dy*dz)
    w_ref   : (Cout, K*P)   bf16   embedding table folded into conv weights
    b_ref   : (Cout, 1)     f32
    o_ref   : (Cout, TM)    f32    lane-dense output (TM on the 128-lane axis)
    """
    idx = idx_ref[...]
    # Single (K*P, TM) one-hot -> ONE MXU push; accumulation happens in the
    # MXU accumulator instead of K separate f32 VALU adds.
    parts = [jnp.where(idx == k, 1.0, 0.0) for k in range(num_classes)]
    onehot = jnp.concatenate(parts, axis=0).astype(jnp.bfloat16)   # (K*P, TM)
    o_ref[...] = (jnp.dot(w_ref[...], onehot,
                          preferred_element_type=jnp.float32) + b_ref[...])


def fused_embed_voxconv(x_idx, table, vox_w, vox_b, down_xyz):
    """Embedding + patchified strided Conv3d, fused.  Returns (B,Cout,T,X',Y',Z')."""
    B, T, X, Y, Z = x_idx.shape
    dx, dy, dz = down_xyz
    K, C = table.shape
    Cout = vox_w.shape[1]
    P = dx * dy * dz
    xd, yd, zd = X // dx, Y // dy, Z // dz

    # conv(Embedding(idx)) is linear in the one-hot class indicator:
    #   W_eff[cout, k*P + p] = sum_c table[k, c] * vox_w[(c, p), cout]
    w3 = vox_w.reshape(C, dx, dy, dz, Cout)
    w_eff = jnp.einsum('kc,cxyzo->okxyz', table, w3).reshape(Cout, K * P)
    w_eff = w_eff.astype(jnp.bfloat16)
    bias = vox_b.reshape(Cout, 1).astype(jnp.float32)

    # transposed index-patch matrix: (P, M) with M = B*T*X'*Y'*Z' on lanes
    # TODO(synk): cast indices to int8 (num_classes <= 127) or express the
    # patchify through the BlockSpec to cut the XLA transpose HBM traffic.
    idxp = x_idx.reshape(B, T, xd, dx, yd, dy, zd, dz)
    idxp = idxp.transpose(3, 5, 7, 0, 1, 2, 4, 6).reshape(P, -1).astype(jnp.int32)
    M = idxp.shape[1]
    tm, m_pad = _pick_tile(M)
    if m_pad != M:
        idxp = jnp.pad(idxp, ((0, 0), (0, m_pad - M)))

    out = pl.pallas_call(
        functools.partial(_embed_conv_kernel, num_classes=K),
        out_shape=jax.ShapeDtypeStruct((Cout, m_pad), jnp.float32),
        grid=(m_pad // tm,),
        in_specs=[
            pl.BlockSpec((P, tm), lambda m: (0, m)),
            pl.BlockSpec((Cout, K * P), lambda m: (0, 0)),
            pl.BlockSpec((Cout, 1), lambda m: (0, 0)),
        ],
        out_specs=pl.BlockSpec((Cout, tm), lambda m: (0, m)),
        compiler_params=pltpu.CompilerParams(
            dimension_semantics=("parallel",),
            vmem_limit_bytes=_VMEM_LIMIT),
    )(idxp, w_eff, bias)

    out = out[:, :M]                                          # drop M padding
    vox = out.reshape(Cout, B, T, xd, yd, zd).transpose(1, 0, 2, 3, 4, 5)
    return vox                                                # (B, Cout, T, X', Y', Z')


# --------------------------------------------------------------------------
# Kernel 2: six plane reductions + InstanceNorm2d, batched over (b,c) volumes
# --------------------------------------------------------------------------

def _planes_kernel(x_ref, red_z_ref, red_y_ref, sel_gx_ref, sel_gt_ref,
                   sel_x_ref, sel_g_ref, mask_y_ref,
                   grp_x_ref, grp_t_ref, grp_y_ref,
                   exp_x_ref, exp_t_ref, exp_y_ref,
                   oxy_ref, oxz_ref, oyz_ref, otx_ref, oty_ref, otz_ref,
                   *, T, X, Y, Z):
    """x_ref block: (G*T*X, Y*Z) f32 -- G (b,c) volumes per step, read once.

    All axis reductions are MXU dots against grid-invariant 0/1 selector
    matrices (precomputed in the wrapper, resident across the grid), so no
    reduce axis sits alone on the lane axis and no in-kernel reshapes occur.
    Norm math stays in f32 (v5e has no bf16 VPU).
    """
    m = x_ref[...]                                            # (G*TX, YZ)

    def dot(a, b):
        return jnp.dot(a, b, preferred_element_type=jnp.float32)

    A = dot(m, red_z_ref[...])                                # (G*TX, Y) sum z
    Bm = dot(m, red_y_ref[...])                               # (G*TX, Z) sum y
    rowsum = jnp.sum(m, axis=1, keepdims=True)                # (G*TX, 1)
    colsum = dot(sel_g_ref[...], m)                           # (G, YZ) sum t,x

    p_xy = dot(sel_gx_ref[...], A) * (1.0 / (T * Z))          # (G*X, Y)
    p_xz = dot(sel_gx_ref[...], Bm) * (1.0 / (T * Y))         # (G*X, Z)
    p_ty = dot(sel_gt_ref[...], A) * (1.0 / (X * Z))          # (G*T, Y)
    p_tz = dot(sel_gt_ref[...], Bm) * (1.0 / (X * Y))         # (G*T, Z)
    p_tx = dot(sel_gt_ref[...], rowsum * sel_x_ref[...]) * (1.0 / (Y * Z))  # (G*T, X)
    p_yz = dot(dot(exp_y_ref[...], colsum) * mask_y_ref[...],
               red_y_ref[...]) * (1.0 / (T * X))              # (G*Y, Z)

    def inorm(p, grp, exp, n):   # InstanceNorm2d per g: biased var, eps=1e-5
        rs = jnp.sum(p, axis=1, keepdims=True)
        mu = dot(exp, dot(grp, rs)) * (1.0 / n)
        d = p - mu
        vs = jnp.sum(d * d, axis=1, keepdims=True)
        var = dot(exp, dot(grp, vs)) * (1.0 / n)
        return d * jax.lax.rsqrt(var + 1e-5)

    oxy_ref[...] = inorm(p_xy, grp_x_ref[...], exp_x_ref[...], X * Y)
    oxz_ref[...] = inorm(p_xz, grp_x_ref[...], exp_x_ref[...], X * Z)
    oyz_ref[...] = inorm(p_yz, grp_y_ref[...], exp_y_ref[...], Y * Z)
    otx_ref[...] = inorm(p_tx, grp_t_ref[...], exp_t_ref[...], T * X)
    oty_ref[...] = inorm(p_ty, grp_t_ref[...], exp_t_ref[...], T * Y)
    otz_ref[...] = inorm(p_tz, grp_t_ref[...], exp_t_ref[...], T * Z)


def _plane_selectors(G, T, X, Y, Z):
    """Grid-invariant 0/1 selector matrices (built once, passed as inputs)."""
    TX, YZ = T * X, Y * Z
    GTX = G * TX

    def eq(a, b):
        return (a[:, None] == b[None, :]).astype(jnp.float32)

    c = jnp.arange(YZ)
    red_z = eq(c // Z, jnp.arange(Y))                          # (YZ, Y)
    red_y = eq(c % Z, jnp.arange(Z))                           # (YZ, Z)

    r = jnp.arange(GTX)
    rg, rt, rx = r // TX, (r % TX) // X, r % X

    gx = jnp.arange(G * X)
    sel_gx = eq(gx // X, rg) * eq(gx % X, rx)                  # (G*X, GTX)
    gt = jnp.arange(G * T)
    sel_gt = eq(gt // T, rg) * eq(gt % T, rt)                  # (G*T, GTX)
    sel_x = eq(rx, jnp.arange(X))                              # (GTX, X)
    sel_g = eq(jnp.arange(G), rg)                              # (G, GTX)

    gy = jnp.arange(G * Y)
    mask_y = eq(gy % Y, c // Z)                                # (G*Y, YZ)

    grp_x = eq(jnp.arange(G), gx // X)                         # (G, G*X)
    grp_t = eq(jnp.arange(G), gt // T)                         # (G, G*T)
    grp_y = eq(jnp.arange(G), gy // Y)                         # (G, G*Y)
    exp_x, exp_t, exp_y = grp_x.T, grp_t.T, grp_y.T

    return (red_z, red_y, sel_gx, sel_gt, sel_x, sel_g, mask_y,
            grp_x, grp_t, grp_y, exp_x, exp_t, exp_y)


def _pick_group(BC, TX, YZ):
    """Volumes per grid step: multiple of 8 (legal sublane blocks), >=2 steps
    when possible, per-step block <= ~6 MiB."""
    vol_bytes = TX * YZ * 4
    budget = 6 * 1024 * 1024
    for g in (32, 16, 8):
        if BC % g == 0 and BC // g >= 2 and g * vol_bytes <= budget:
            return g
    if BC * vol_bytes <= budget:
        return BC                      # single step; full-array blocks are legal
    for g in (4, 2, 1):
        if BC % g == 0 and (g * TX) % 8 == 0 and g * vol_bytes <= budget:
            return g
    return BC


def fused_vox_to_planes(x):
    """x: (B, C, T, X', Y', Z') f32 -> list of 6 planes (B, C, H, W).

    Plane order matches the downsampler ratio list:
    (x,y), (x,z), (y,z), (t,x), (t,y), (t,z).
    """
    # TODO(synk): vox_to_planes is abstract in EncoderBase; this is one concrete
    # realization (mean over the complementary axes + InstanceNorm2d).
    B, C, T, X, Y, Z = x.shape
    BC = B * C
    TX, YZ = T * X, Y * Z
    G = _pick_group(BC, TX, YZ)
    n_steps = BC // G

    xs = x.reshape(BC * TX, YZ)
    sels = _plane_selectors(G, T, X, Y, Z)

    out_shapes = (
        jax.ShapeDtypeStruct((BC * X, Y), jnp.float32),
        jax.ShapeDtypeStruct((BC * X, Z), jnp.float32),
        jax.ShapeDtypeStruct((BC * Y, Z), jnp.float32),
        jax.ShapeDtypeStruct((BC * T, X), jnp.float32),
        jax.ShapeDtypeStruct((BC * T, Y), jnp.float32),
        jax.ShapeDtypeStruct((BC * T, Z), jnp.float32),
    )
    blk_rows = (G * X, G * X, G * Y, G * T, G * T, G * T)
    blk_cols = (Y, Z, Z, X, Y, Z)
    out_specs = tuple(
        pl.BlockSpec((r, w), lambda i: (i, 0))
        for r, w in zip(blk_rows, blk_cols))

    in_specs = [pl.BlockSpec((G * TX, YZ), lambda i: (i, 0))] + [
        pl.BlockSpec(s.shape, lambda i: (0, 0)) for s in sels]   # constant -> DMA once

    planes = pl.pallas_call(
        functools.partial(_planes_kernel, T=T, X=X, Y=Y, Z=Z),
        out_shape=out_shapes,
        grid=(n_steps,),
        in_specs=in_specs,
        out_specs=out_specs,
        compiler_params=pltpu.CompilerParams(
            dimension_semantics=("parallel",),
            vmem_limit_bytes=_VMEM_LIMIT),
    )(xs, *sels)

    dims = [(X, Y), (X, Z), (Y, Z), (T, X), (T, Y), (T, Z)]
    return [p.reshape(B, C, h, w) for p, (h, w) in zip(planes, dims)]


# --------------------------------------------------------------------------
# Kernel 3: PlaneDownsamplers (strided Conv2d, kernel == stride), block-diag
# --------------------------------------------------------------------------

def _matmul_t_kernel(a_ref, w_ref, b_ref, o_ref):
    """o (GN, TM) = Wbd (GN, GK) @ A (GK, TM) + b (GN, 1)."""
    o_ref[...] = (jnp.dot(w_ref[...], a_ref[...],
                          preferred_element_type=jnp.float32) + b_ref[...])


def _grouped_matmul_t(At, Wbd, Bs):
    """At (G,K,M) bf16, Wbd (G*N,G*K) bf16 block-diagonal, Bs (G*N,1) f32."""
    Gp, K, M = At.shape
    GN = Wbd.shape[0]
    A2 = At.reshape(Gp * K, M)
    tm, m_pad = _pick_tile(M)
    if m_pad != M:
        A2 = jnp.pad(A2, ((0, 0), (0, m_pad - M)))
    out = pl.pallas_call(
        _matmul_t_kernel,
        out_shape=jax.ShapeDtypeStruct((GN, m_pad), jnp.float32),
        grid=(m_pad // tm,),
        in_specs=[
            pl.BlockSpec((Gp * K, tm), lambda m: (0, m)),
            pl.BlockSpec((GN, Gp * K), lambda m: (0, 0)),
            pl.BlockSpec((GN, 1), lambda m: (0, 0)),
        ],
        out_specs=pl.BlockSpec((GN, tm), lambda m: (0, m)),
        compiler_params=pltpu.CompilerParams(
            dimension_semantics=("parallel",),
            vmem_limit_bytes=_VMEM_LIMIT),
    )(A2, Wbd, Bs)
    return out[:, :M].reshape(Gp, GN // Gp, M)


def plane_downsamplers_apply(planes, ws, bs, ratios):
    """Six PlaneDownsamplers; same-shape planes fold into ONE block-diag matmul."""
    # TODO(synk): fuse this patchify/transpose prep into kernel 2's output layout
    # to remove the remaining XLA-side HBM round trip (tiny tensors here).
    n = len(planes)
    prepped, keys = [], []
    for p, w, b, (dh, dw) in zip(planes, ws, bs, ratios):
        B, C, H, W = p.shape
        hd, wd = H // dh, W // dw
        at = p.reshape(B, C, hd, dh, wd, dw).transpose(1, 3, 5, 0, 2, 4)
        at = at.reshape(C * dh * dw, B * hd * wd)             # (K, M), C-major K
        prepped.append((at.astype(jnp.bfloat16),
                        w.T.astype(jnp.bfloat16),              # (Cout, K)
                        b.reshape(-1, 1).astype(jnp.float32),
                        (B, hd, wd, w.shape[1])))
        keys.append((at.shape, w.shape))

    outs = [None] * n
    groups = defaultdict(list)
    for i, kkey in enumerate(keys):
        groups[kkey].append(i)
    for idxs in groups.values():
        At = jnp.stack([prepped[i][0] for i in idxs])                       # (G,K,M)
        Wbd = block_diag(*[prepped[i][1] for i in idxs]).astype(jnp.bfloat16)
        Bs = jnp.concatenate([prepped[i][2] for i in idxs], axis=0)         # (G*N,1)
        res = _grouped_matmul_t(At, Wbd, Bs)                                # (G,N,M)
        for g, i in enumerate(idxs):
            B_, hd, wd, cout = prepped[i][3]
            outs[i] = res[g].reshape(cout, B_, hd, wd).transpose(1, 0, 2, 3)
    return outs


# --------------------------------------------------------------------------
# EncoderBase.forward
# --------------------------------------------------------------------------

def encoder_forward(x_idx, params, conf):
    # x.detach().clone() -> no-op; separate_t_encoder == False in this config.
    vox = fused_embed_voxconv(x_idx, params["embedding"], params["vox_w"],
                              params["vox_b"], conf["down_xyz"])
    planes = fused_vox_to_planes(vox)
    return plane_downsamplers_apply(planes, params["ds_w"], params["ds_b"],
                                    conf["hex_ratios"])


# --------------------------------------------------------------------------
# demo
# --------------------------------------------------------------------------

if __name__ == "__main__":
    key = jax.random.PRNGKey(0)
    B, T, X, Y, Z = 2, 4, 8, 8, 8
    num_classes, C = 6, 8
    conf = dict(
        latent_channels=C,
        down_xyz=(2, 2, 2),
        hex_ratios=[(2, 2)] * 6,
    )

    keys = jax.random.split(key, 16)
    dx, dy, dz = conf["down_xyz"]
    params = dict(
        embedding=jax.random.normal(keys[0], (num_classes, C), jnp.float32),
        vox_w=0.1 * jax.random.normal(keys[1], (C * dx * dy * dz, C), jnp.float32),
        vox_b=0.1 * jax.random.normal(keys[2], (C,), jnp.float32),
        ds_w=[0.1 * jax.random.normal(keys[3 + i], (C * 2 * 2, C), jnp.float32)
              for i in range(6)],
        ds_b=[0.1 * jax.random.normal(keys[9 + i], (C,), jnp.float32)
              for i in range(6)],
    )

    x_idx = jax.random.randint(keys[15], (B, T, X, Y, Z), 0, num_classes,
                               dtype=jnp.int32)

    out = encoder_forward(x_idx, params, conf)
    out = jax.block_until_ready(out)
    assert len(out) == 6
    for p in out:
        assert p.shape == (B, C, 2, 2), p.shape
    print("KERNEL_OK")
</pallas_src>

<mosaic_0001>
module attributes {stable_mosaic.version = 11 : i64} {
  func.func @_embed_conv_kernel(%arg0: i32, %arg1: memref<8x256xi32, #tpu.memory_space<vmem>>, %arg2: memref<8x48xbf16, #tpu.memory_space<vmem>>, %arg3: memref<8x1xf32, #tpu.memory_space<vmem>>, %arg4: memref<8x256xf32, #tpu.memory_space<vmem>>) attributes {dimension_semantics = [#tpu.dimension_semantics<parallel>], iteration_bounds = array<i64: 2>, scalar_prefetch = 0 : i64, scratch_operands = 0 : i64, tpu.core_type = #tpu.core_type<tc>, window_params = [{transform_indices = @transform_0, window_bounds = array<i64: 8, 256>}, {pipeline_mode = #tpu.pipeline_mode<synchronous>, transform_indices = @transform_1, window_bounds = array<i64: 8, 48>}, {pipeline_mode = #tpu.pipeline_mode<synchronous>, transform_indices = @transform_2, window_bounds = array<i64: 8, 1>}, {transform_indices = @transform_3, window_bounds = array<i64: 8, 256>}]} {
    %c0 = arith.constant 0 : index
    %c0_0 = arith.constant 0 : index
    %0 = vector.load %arg1[%c0, %c0_0] : memref<8x256xi32, #tpu.memory_space<vmem>>, vector<8x256xi32>
    %c0_i32 = arith.constant 0 : i32
    %1 = vector.broadcast %c0_i32 : i32 to vector<8x256xi32>
    %2 = arith.cmpi eq, %0, %1 : vector<8x256xi32>
    %cst = arith.constant 1.000000e+00 : f32
    %cst_1 = arith.constant 0.000000e+00 : f32
    %3 = vector.broadcast %cst : f32 to vector<8x256xf32>
    %4 = vector.broadcast %cst_1 : f32 to vector<8x256xf32>
    %5 = arith.select %2, %3, %4 : vector<8x256xi1>, vector<8x256xf32>
    %c1_i32 = arith.constant 1 : i32
    %6 = vector.broadcast %c1_i32 : i32 to vector<8x256xi32>
    %7 = arith.cmpi eq, %0, %6 : vector<8x256xi32>
    %cst_2 = arith.constant 1.000000e+00 : f32
    %cst_3 = arith.constant 0.000000e+00 : f32
    %8 = vector.broadcast %cst_2 : f32 to vector<8x256xf32>
    %9 = vector.broadcast %cst_3 : f32 to vector<8x256xf32>
    %10 = arith.select %7, %8, %9 : vector<8x256xi1>, vector<8x256xf32>
    %c2_i32 = arith.constant 2 : i32
    %11 = vector.broadcast %c2_i32 : i32 to vector<8x256xi32>
    %12 = arith.cmpi eq, %0, %11 : vector<8x256xi32>
    %cst_4 = arith.constant 1.000000e+00 : f32
    %cst_5 = arith.constant 0.000000e+00 : f32
    %13 = vector.broadcast %cst_4 : f32 to vector<8x256xf32>
    %14 = vector.broadcast %cst_5 : f32 to vector<8x256xf32>
    %15 = arith.select %12, %13, %14 : vector<8x256xi1>, vector<8x256xf32>
    %c3_i32 = arith.constant 3 : i32
    %16 = vector.broadcast %c3_i32 : i32 to vector<8x256xi32>
    %17 = arith.cmpi eq, %0, %16 : vector<8x256xi32>
    %cst_6 = arith.constant 1.000000e+00 : f32
    %cst_7 = arith.constant 0.000000e+00 : f32
    %18 = vector.broadcast %cst_6 : f32 to vector<8x256xf32>
    %19 = vector.broadcast %cst_7 : f32 to vector<8x256xf32>
    %20 = arith.select %17, %18, %19 : vector<8x256xi1>, vector<8x256xf32>
    %c4_i32 = arith.constant 4 : i32
    %21 = vector.broadcast %c4_i32 : i32 to vector<8x256xi32>
    %22 = arith.cmpi eq, %0, %21 : vector<8x256xi32>
    %cst_8 = arith.constant 1.000000e+00 : f32
    %cst_9 = arith.constant 0.000000e+00 : f32
    %23 = vector.broadcast %cst_8 : f32 to vector<8x256xf32>
    %24 = vector.broadcast %cst_9 : f32 to vector<8x256xf32>
    %25 = arith.select %22, %23, %24 : vector<8x256xi1>, vector<8x256xf32>
    %c5_i32 = arith.constant 5 : i32
    %26 = vector.broadcast %c5_i32 : i32 to vector<8x256xi32>
    %27 = arith.cmpi eq, %0, %26 : vector<8x256xi32>
    %cst_10 = arith.constant 1.000000e+00 : f32
    %cst_11 = arith.constant 0.000000e+00 : f32
    %28 = vector.broadcast %cst_10 : f32 to vector<8x256xf32>
    %29 = vector.broadcast %cst_11 : f32 to vector<8x256xf32>
    %30 = arith.select %27, %28, %29 : vector<8x256xi1>, vector<8x256xf32>
    %31 = tpu.concatenate %5, %10, %15, %20, %25, %30 in 0 : vector<8x256xf32>, vector<8x256xf32>, vector<8x256xf32>, vector<8x256xf32>, vector<8x256xf32>, vector<8x256xf32> -> vector<48x256xf32>
    %32 = arith.truncf %31 : vector<48x256xf32> to vector<48x256xbf16>
    %c0_12 = arith.constant 0 : index
    %c0_13 = arith.constant 0 : index
    %33 = vector.load %arg2[%c0_12, %c0_13] : memref<8x48xbf16, #tpu.memory_space<vmem>>, vector<8x48xbf16>
    %cst_14 = arith.constant dense<0.000000e+00> : vector<8x256xf32>
    %34 = tpu.matmul %33, %32, %cst_14 {dimension_numbers = #tpu.dot_dimension_numbers<[1], [0], [0], [1], [0, 0, 1, 1], [], []>} : vector<8x48xbf16>, vector<48x256xbf16>, vector<8x256xf32> -> vector<8x256xf32>
    %c0_15 = arith.constant 0 : index
    %c0_16 = arith.constant 0 : index
    %35 = vector.load %arg3[%c0_15, %c0_16] : memref<8x1xf32, #tpu.memory_space<vmem>>, vector<8x1xf32>
    %36 = vector.broadcast %35 : vector<8x1xf32> to vector<8x256xf32>
    %37 = arith.addf %34, %36 : vector<8x256xf32>
    %c0_17 = arith.constant 0 : index
    %c0_18 = arith.constant 0 : index
    %38 = vector.load %arg4[%c0_17, %c0_18] : memref<8x256xf32, #tpu.memory_space<vmem>>, vector<8x256xf32>
    tpu.vector_store %arg4[%c0_17, %c0_18], %37 {strides = array<i32>} : memref<8x256xf32, #tpu.memory_space<vmem>>, vector<8x256xf32>,
    return
  }
  func.func @transform_0(%arg0: i32) -> (i32, i32) {
    %c0_i32 = arith.constant 0 : i32
    %c0_i32_0 = arith.constant 0 : i32
    return %c0_i32, %arg0 : i32, i32
  }
  func.func @transform_1(%arg0: i32) -> (i32, i32) {
    %c0_i32 = arith.constant 0 : i32
    %c0_i32_0 = arith.constant 0 : i32
    %c0_i32_1 = arith.constant 0 : i32
    return %c0_i32, %c0_i32_0 : i32, i32
  }
  func.func @transform_2(%arg0: i32) -> (i32, i32) {
    %c0_i32 = arith.constant 0 : i32
    %c0_i32_0 = arith.constant 0 : i32
    %c0_i32_1 = arith.constant 0 : i32
    return %c0_i32, %c0_i32_0 : i32, i32
  }
  func.func @transform_3(%arg0: i32) -> (i32, i32) {
    %c0_i32 = arith.constant 0 : i32
    %c0_i32_0 = arith.constant 0 : i32
    return %c0_i32, %arg0 : i32, i32
  }
}

</mosaic_0001>

<bundles_post_ra>
// kernel: tpu_custom_call.1
= control target key start
LH: loop header
LB: loop body
LE: loop exit
PB: predicated region body
PF: predicated region fallthrough
CT: control target
= control target key end

     0   :  { %8 = vsyncpa [#allocation3], 0  ;;  %s732_s0 = inlined_call_operand.hbm [shape: s32[8,512], index: 0, kind: input, shape index: {}]   ;;  %s733_s1 = inlined_call_operand.vmem [shape: bf16[8,48], index: 1, kind: input, shape index: {}]   ;;  %s734_s2 = inlined_call_operand.vmem [shape: f32[8,1], index: 2, kind: input, shape index: {}]   ;;  %s735_s3 = inlined_call_operand.hbm [shape: f32[8,512], index: 3, kind: output, shape index: {}]  }
   0x1   :  { %10 = vsyncpa [#allocation3 + $0x1], 0 }
   0x2   :  { %11 = vsyncpa [#allocation4], 0 }
   0x3   :  { %13 = vsyncpa [#allocation4 + $0x1], 0  ;;  %s561_s12 = smov 0   ;;  %s563_s13 = smov 0  }
   0x4   :  { %s565_s14 = smov 0   ;;  %s567_s15 = smov 0  }
   0x5 LB: > { %s582_s16 = sadd.s32 4294967295, %s535_s15   ;;  %s361_s17 = sadd.s32 4294967294, %s535_s15   ;;  %s535_s15 = sphi %s567_s15, %s750_s15   ;;  %s531_s14 = sphi %s565_s14, %s749_s14   ;;  %s527_s13 = sphi %s563_s13, %s748_s13   ;;  %s523_s12 = sphi %s561_s12, %s747_s12  }
   0x6   : > { %s586_s18 = sadd.s32 1, %s535_s15   ;;  %s26_s19 = sadd.s32 1, %s531_s14 }
   0x7   : > { %s23_s20 = ssub.s32 %s535_s15, %s586_s18  ;;  %p33_p0 = scmp.ne.s32.totalorder %s531_s14, %s527_s13 }
   0x8   : > { %p24_p1 = scmp.eq.s32.totalorder %s23_s20, 0  ;;  %p34_p2 = scmp.eq.s32.totalorder %s535_s15, 0 }
   0x9   : > { %p39_p3 = scmp.ne.s32.totalorder %s527_s13, %s523_s12  ;;  %p40_p4 = scmp.eq.s32.totalorder %s582_s16, 0 }
   0xa   : > { %s598_s21 = scalar_select %p24_p1, %s531_s14, %s26_s19  }
   0xb   : > { %p600_p5 = por %p34_p2, %p33_p0  ;;  %p604_p6 = por %p40_p4, %p39_p3 }
   0xc   : > { %p105_p7 = scmp.eq.s32.totalorder %s582_s16, 1  ;;  %p111_p8 = scmp.eq.s32.totalorder %s361_s17, 1 }
   0xd   : > { %p402_p10 = scmp.lt.s32.totalorder %s535_s15, 2  ;;  %s137_s26 = sand.u32 1, %s531_s14  }
   0xe   : > { %p611_p11 = por %p105_p7, %p33_p0  ;;  %p615_p12 = por %p111_p8, %p39_p3 }
   0xf   : > { %s388_s27 = sshll.u32 %s535_s15, 8  ;;  %s364_s28 = sshll.u32 %s137_s26, 4 }
  0x10   : > { %s739_s24 = scalar_select %p611_p11, 1, 0 }
  0x11   : > { %s740_s25 = scalar_select %p615_p12, 1, 0 }
  0x12   : > { %s624_s4 = scalar_lea.hbm %s732_s0, %s388_s27  ;;  %s141_s5 = scalar_lea.vmem [#allocation2], %s364_s28 }
  0x13   : > { %s149_s6 = sshll.u32 %s141_s5, 4  ;;  %p628_p13 = pnand %p402_p10, %p600_p5  ;;  %s632_s6 = int_to_ptr.vmem [resolvable:$true] %s149_s6 }
  0x14   : > { %s138_s8 = scalar_lea.sflag [#allocation3], %s137_s26  ;;  %s439_s9 = scalar_lea.hbm %s624_s4, 256 }
  0x15   : > { %p440_p2 = scmp.ne.s32.totalorder %s624_s4, %s439_s9  ;;  %p441_p3 = pneg %p628_p13 }
  0x16   : > { %s444_s17 = scalar_lea.hbm %s732_s0, 512  ;;  %p445_p5 = scmp.lt.u32.totalorder %s624_s4, %s732_s0 }
  0x17   : > { %p442_p4 = pnand %p441_p3, %p440_p2  ;;  %p446_p8 = scmp.lt.u32.totalorder %s444_s17, %s439_s9 }
  0x18   : > { %p448_p9 = scmp.lt.u32.totalorder %s439_s9, %s624_s4 }
  0x19   : > { %p443_p7 = pneg %p442_p4  ;;  %p447_p10 = por %p446_p8, %p445_p5 }
  0x1b   : > { %p449_p0 = por %p448_p9, %p447_p10 }
  0x1d   : > { %p450_p1 = pnand %p449_p0, %p443_p7 }
  0x1f   : > { %453 = shalt.err (!%p450_p1)
}
  0x20   : > { %s454_s22 = scalar_lea.vmem %s632_s6, 256  ;;  %s537_s26 = smov [#allocation2]  }
  0x21   : > { %p455_p2 = scmp.ne.s32.totalorder %s632_s6, %s454_s22  ;;  %s459_s27 = sshll.u32 %s537_s26, 4  ;;  %s460_s27 = int_to_ptr.vmem [resolvable:$false] %s459_s27 }
  0x22   : > { %s461_s28 = scalar_lea.vmem %s460_s27, 512  ;;  %p462_p11 = scmp.lt.s32.totalorder %s632_s6, %s460_s27 }
  0x23   : > { %p457_p4 = pnand %p455_p2, %p441_p3  ;;  %p463_p5 = scmp.lt.s32.totalorder %s461_s28, %s454_s22 }
  0x25   : > { %p458_p12 = pneg %p457_p4  ;;  %p464_p8 = por %p463_p5, %p462_p11 }
  0x27   : > { %p465_p9 = pnand %p464_p8, %p458_p12 }
  0x29   : > { %468 = shalt.err (!%p465_p9)
}
  0x2a   : > { %397 = dma.hbm_to_vmem [thread:$0]  (!%p628_p13), %s624_s4, 256, %s632_s6, %s138_s8  }
  0x2b   : > { %p742_p0 = scmp.lt.s32.totalorder %s535_s15, 3  ;;  %p743_p1 = scmp.ge.s32.totalorder %s535_s15, 1 }
  0x2d   : > { %p155_p3 = pnand %p743_p1, %p742_p0 }
  0x2e   : > { %s666_s29 = sand.u32 (!%p155_p3), 1, %s527_s13  }
  0x2f   : > { %158 = sbr.rel (%p155_p3) target bundleno = 299 (0x12b), region = 32  ;;  %s368_s30 = sshll.u32 (!%p155_p3), %s666_s29, 4 }
  0x30   : > { %s161_s5 = scalar_lea.sflag (!%p155_p3), [#allocation3], %s666_s29  ;;  %s164_s7 = scalar_lea.vmem (!%p155_p3), [#allocation2], %s368_s30 }
  0x36   : > { %514 = dma.done.wait (%p604_p6), %s161_s5, 256  }
  0x37   : > { %516 = vsyncadd (%p604_p6), %s161_s5, 4294967040  ;;  %v538_v0 = vmov 0   ;;  %v191_v1 = vld [vmem:[%s164_s7 + $0x8] sm:$0xff]  ;;  %v190_v2 = vld [vmem:[%s164_s7] sm:$0xff]  ;;  %v539_v4 = vmov 1.0|1.0  }
  0x38   : > { %265 = vmatprep.mubr.bf16.mxu0 %v538_v0  ;;  %438 = vset.pattern.permute.xlu0 %v538_v0  ;;  %vm193_vm0 = vcmp.eq.s32.totalorder %v191_v1, 0  ;;  %vm197_vm1 = vcmp.eq.s32.totalorder %v191_v1, 1  ;;  %vm192_vm2 = vcmp.eq.s32.totalorder %v190_v2, 0  ;;  %vm196_vm3 = vcmp.eq.s32.totalorder %v190_v2, 1  ;;  %v223_v3 = vld [vmem:[%s734_s2] sm:$0xff]  ;;  %s389_s9 = sshll.u32 %s582_s16, 8 }
  0x39   : > { %vm370_vm4 = vmpackc.low %vm197_vm1, %vm193_vm0  ;;  %vm201_vm5 = vcmp.eq.s32.totalorder %v191_v1, 2  ;;  %vm205_vm6 = vcmp.eq.s32.totalorder %v191_v1, 3  ;;  %vm200_vm7 = vcmp.eq.s32.totalorder %v190_v2, 2  ;;  %vm204_vm8 = vcmp.eq.s32.totalorder %v190_v2, 3  ;;  %226 = vperm.xlu0 %438, %v223_v3   ;;  %v222_v5 = vld [vmem:[%s733_s1] sm:$0xf]  ;;  %s688_s20 = scalar_lea.hbm %s735_s3, %s389_s9 }
  0x3a   : > { %371 = vmatprep.subr.msk.bf16.mxu0 %vm370_vm4, %v539_v4  ;;  %vm372_vm9 = vmpackc.low %vm196_vm3, %vm192_vm2  ;;  %vm209_vm10 = vcmp.eq.s32.totalorder %v191_v1, 4  ;;  %vm213_vm11 = vcmp.eq.s32.totalorder %v191_v1, 5  ;;  %vm208_vm15 = vcmp.eq.s32.totalorder %v190_v2, 4  ;;  %vm212_vm0 = vcmp.eq.s32.totalorder %v190_v2, 5  ;;  %s186_s10 = scalar_lea.vmem [#allocation5], %s368_s30  ;;  %s277_s16 = scalar_lea.sflag [#allocation4], %s666_s29 }
  0x3b   : > { %373 = vmatpush1.bf16.msk.msra.mxu0 %vm372_vm9, %v539_v4  ;;  %vm374_vm12 = vmpackc.low %vm205_vm6, %vm201_vm5  ;;  %vm229_vm2 = vcmask 392192   ;;  %s291_s11 = sshll.u32 %s186_s10, 4  ;;  %p744_p11 = scmp.ne.s32.totalorder %s739_s24, 0  ;;  %s690_s11 = int_to_ptr.vmem [resolvable:$true] %s291_s11 }
  0x3c   : > { %375 = vmatprep.subr.msk.bf16.mxu0 %vm374_vm12, %v539_v4  ;;  %vm376_vm13 = vmpackc.low %vm204_vm8, %vm200_vm7  ;;  %s469_s22 = scalar_lea.vmem %s690_s11, 256  ;;  %s540_s26 = smov [#allocation5]  }
  0x3d   : > { %vm378_vm14 = vmpackc.low %vm213_vm11, %vm209_vm10  ;;  %p470_p6 = scmp.ne.s32.totalorder %s690_s11, %s469_s22  ;;  %s473_s27 = sshll.u32 %s540_s26, 4  ;;  %s474_s27 = int_to_ptr.vmem [resolvable:$false] %s473_s27 }
  0x3e   : > { %vm380_vm1 = vmpackc.low %vm212_vm0, %vm208_vm15  ;;  %s475_s28 = scalar_lea.vmem %s474_s27, 512  ;;  %p476_p7 = scmp.lt.s32.totalorder %s690_s11, %s474_s27 }
  0x3f   : > { %377 = vmatpush1.bf16.msk.msra.mxu0 %vm376_vm13, %v539_v4  ;;  %p471_p12 = pnand %p470_p6, %p744_p11  ;;  %p477_p10 = scmp.lt.s32.totalorder %s475_s28, %s469_s22 }
  0x40   : > { %379 = vmatprep.subr.msk.bf16.mxu0 %vm378_vm14, %v539_v4 }
  0x41   : > { %p472_p13 = pneg %p471_p12  ;;  %p478_p2 = por %p477_p10, %p476_p7 }
  0x43   : > { %381 = vmatpush1.bf16.msk.msra.mxu0 %vm380_vm1, %v539_v4  ;;  %p479_p4 = pnand %p478_p2, %p472_p13 }
  0x46   : > { %382 = vmatmul.mubr.msk.bf16.vlgmr.msra.gmra.mrb[0].mxu0 %vm229_vm2, %v222_v5 }
  0xb8   : > { %v227_v6 = vpop.permute.xlu0 %226 }
 0x119   : > { %v267_v7 = vpop.f32.mrb[0].mxu0 }
 0x11a   : > { %v268_v8 = vadd.f32 %v267_v7, %v227_v6  ;;  %v269_v9 = vpop.f32.mrb[1].mxu0 }
 0x11b   : > { %v270_v10 = vadd.f32 %v269_v9, %v227_v6  ;;  %v271_v11 = vpop.f32.mrb[2].mxu0 }
 0x11c   : > { %274 = vst [vmem:[%s186_s10] sm:$0xff] %v268_v8  ;;  %v272_v12 = vpop.f32.mrb[3].mxu0 }
 0x11d   : > { %275 = vst [vmem:[%s186_s10 + $0x8] sm:$0xff] %v270_v10 }
 0x11e   : > { %482 = shalt.err (!%p479_p4)
}
 0x11f   : > { %s483_s29 = scalar_lea.hbm %s688_s20, 256  ;;  %s487_s7 = scalar_lea.hbm %s735_s3, 512 }
 0x120   : > { %p484_p5 = scmp.ne.s32.totalorder %s688_s20, %s483_s29  ;;  %p488_p0 = scmp.lt.u32.totalorder %s688_s20, %s735_s3 }
 0x121   : > { %p489_p1 = scmp.lt.u32.totalorder %s487_s7, %s483_s29  ;;  %p491_p6 = scmp.lt.u32.totalorder %s483_s29, %s688_s20 }
 0x122   : > { %p485_p8 = pnand %p484_p5, %p744_p11 }
 0x123   : > { %p490_p3 = por %p489_p1, %p488_p0 }
 0x124   : > { %p486_p9 = pneg %p485_p8 }
 0x125   : > { %p492_p12 = por %p491_p6, %p490_p3 }
 0x127   : > { %p493_p13 = pnand %p492_p12, %p486_p9 }
 0x129   : > { %496 = shalt.err (!%p493_p13)
}
 0x12a   : > { %392 = dma.vmem_to_hbm [thread:$0]  (%p744_p11), %s690_s11, 256, %s688_s20, %s277_s16  }
 0x12b PF: > { %s303_s23 = sand.u32 1, %s523_s12   ;;  %p745_p7 = scmp.ne.s32.totalorder %s740_s25, 0 }
 0x12c   : > { %p746_p10 = scmp.ge.s32.totalorder %s535_s15, 2  ;;  %s304_s8 = scalar_lea.sflag [#allocation4], %s303_s23 }
 0x12e   : > { %p399_p2 = pnand %p746_p10, %p745_p7 }
 0x130   : > { %518 = dma.done.wait (!%p399_p2), %s304_s8, 256  }
 0x131   : > { %520 = vsyncadd (!%p399_p2), %s304_s8, 4294967040  ;;  %p16_p4 = scmp.ge.s32.totalorder %s586_s18, 4   ;;  %s747_s12 = smov %s527_s13 }
 0x132   : > { %s748_s13 = smov %s531_s14  ;;  %s749_s14 = smov %s598_s21 }
 0x133   : > { %s750_s15 = smov %s586_s18  ;;  %18 = sbr.rel (!%p16_p4) target bundleno = 5 (0x5), region = 77 }
 0x13a   :  { %309 = vsyncpa [#allocation3], 1 }
 0x13b   :  { %311 = vsyncpa [#allocation3 + $0x1], 1 }
 0x13c   :  { %312 = vsyncpa [#allocation4], 1 }
 0x13d   :  { %314 = vsyncpa [#allocation4 + $0x1], 1 }

</bundles_post_ra>
